<compile_context>
chip_gen: v7x
topology: tpu7x:2x2x1
jax: 0.10.0
libtpu: 0.0.40
codegen_flags: <defaults>
</compile_context>

<pallas_src>
import functools

import jax
import jax.numpy as jnp
from jax.experimental import pallas as pl
from jax.experimental.pallas import tpu as pltpu

LANE = 128


def _round_up(x, m):
    return ((x + m - 1) // m) * m


def cqr_dqn_kernel(x_ref, w1_ref, w2_ref, w3_ref, b_ref, out_ref):
    """One batch tile of the fused 3-layer MLP.

    x_ref  : (TB, state_dim) f32         -- streamed per grid step
    w*_ref : bf16 weights, (in, out)     -- VMEM-resident (constant index_map)
    b_ref  : (3, PB) f32 packed biases   -- row0=b1, row1=b2, row2=b3 (zero padded)
    out_ref: (TB, P_out) f32             -- lane-dense (128-multiple) padded output
    """
    L = w1_ref.shape[1]
    P_out = out_ref.shape[1]

    x = x_ref[...].astype(jnp.bfloat16)
    b = b_ref[...]  # (3, PB) f32

    # head_1 + relu   (bf16 MXU matmul, f32 accumulate / epilogue)
    h1 = jnp.dot(x, w1_ref[...], preferred_element_type=jnp.float32)
    h1 = jnp.maximum(h1 + b[0:1, :L], 0.0)

    # ff_1 + relu
    h2 = jnp.dot(h1.astype(jnp.bfloat16), w2_ref[...],
                 preferred_element_type=jnp.float32)
    h2 = jnp.maximum(h2 + b[1:2, :L], 0.0)

    # ff_2 (no activation) -> lane-dense padded output
    out = jnp.dot(h2.astype(jnp.bfloat16), w3_ref[...],
                  preferred_element_type=jnp.float32)
    out_ref[...] = (out + b[2:3, :P_out]).astype(out_ref.dtype)


def prepare_params(params, action_size, N):
    """f32 (in,out) Linear params -> kernel-ready form:
    bf16 weights, 128-lane-padded final layer, biases packed into one f32 slab."""
    w1, b1, w2, b2, w3, b3 = params
    L = w1.shape[1]
    out_dim = action_size * N
    P_out = _round_up(out_dim, LANE)           # lane-dense output width
    PB = max(_round_up(L, LANE), P_out)        # bias-slab lane width

    w3p = jnp.zeros((L, P_out), jnp.float32).at[:, :out_dim].set(w3)
    b_all = jnp.zeros((3, PB), jnp.float32)
    b_all = b_all.at[0, :L].set(b1.reshape(-1))
    b_all = b_all.at[1, :L].set(b2.reshape(-1))
    b_all = b_all.at[2, :out_dim].set(b3.reshape(-1))

    return (w1.astype(jnp.bfloat16),
            w2.astype(jnp.bfloat16),
            w3p.astype(jnp.bfloat16),
            b_all)


@functools.partial(jax.jit, static_argnames=("N", "action_size"))
def cqr_dqn_forward(x, prepped, N, action_size):
    """x: (B, state_dim) f32.  Returns (B, N, action_size) f32."""
    w1, w2, w3p, b_all = prepped
    B, state_dim = x.shape
    out_dim = action_size * N
    P_out = w3p.shape[1]

    # Tile over batch; weights/biases are VMEM-resident (constant index_map).
    TB = 128 if B >= 128 else B            # block == full dim is always legal when B < 128
    B_pad = pl.cdiv(B, TB) * TB
    if B_pad != B:
        x = jnp.pad(x, ((0, B_pad - B), (0, 0)))
    grid = (B_pad // TB,)

    def resident(shape):
        return pl.BlockSpec(shape, lambda i: (0, 0))

    out_flat = pl.pallas_call(
        cqr_dqn_kernel,
        out_shape=jax.ShapeDtypeStruct((B_pad, P_out), jnp.float32),
        grid=grid,
        in_specs=[
            pl.BlockSpec((TB, state_dim), lambda i: (i, 0)),   # streamed x tile
            resident(w1.shape),
            resident(w2.shape),
            resident(w3p.shape),
            resident(b_all.shape),
        ],
        out_specs=pl.BlockSpec((TB, P_out), lambda i: (i, 0)),  # streamed lane-dense out tile
        compiler_params=pltpu.CompilerParams(
            dimension_semantics=("parallel",)),   # v7x: both TCs split the batch
    )(x, w1, w2, w3p, b_all)

    return out_flat[:B, :out_dim].reshape(B, N, action_size)


def init_params(key, state_dim, layer_size, action_size, N):
    """Deterministic synthetic init mimicking nn.Linear's U(-1/sqrt(fan_in), 1/sqrt(fan_in)).
    Weights stored as (in, out) so the kernel computes x @ W + b."""
    def linear(key, fan_in, fan_out):
        kw, kb = jax.random.split(key)
        bound = 1.0 / jnp.sqrt(fan_in)
        w = jax.random.uniform(kw, (fan_in, fan_out), jnp.float32, -bound, bound)
        b = jax.random.uniform(kb, (1, fan_out), jnp.float32, -bound, bound)
        return w, b

    k1, k2, k3 = jax.random.split(key, 3)
    w1, b1 = linear(k1, state_dim, layer_size)         # head_1
    w2, b2 = linear(k2, layer_size, layer_size)        # ff_1
    w3, b3 = linear(k3, layer_size, action_size * N)   # ff_2
    return (w1, b1, w2, b2, w3, b3)


def reference_forward(x, params, N, action_size):
    """Plain-JAX reference with the same bf16-operand / f32-accumulate math."""
    w1, b1, w2, b2, w3, b3 = params
    bf = jnp.bfloat16
    h = jnp.dot(x.astype(bf), w1.astype(bf), preferred_element_type=jnp.float32) + b1
    h = jnp.maximum(h, 0.0)
    h = jnp.dot(h.astype(bf), w2.astype(bf), preferred_element_type=jnp.float32) + b2
    h = jnp.maximum(h, 0.0)
    out = jnp.dot(h.astype(bf), w3.astype(bf), preferred_element_type=jnp.float32) + b3
    return out.reshape(x.shape[0], N, action_size)


if __name__ == "__main__":
    # Small shapes consistent with the module:
    # state_size=(4,), action_size=2, layer_size=32, N=8
    state_dim = 4
    action_size = 2
    layer_size = 32
    N = 8

    key = jax.random.PRNGKey(0)
    kx, kp, kx2 = jax.random.split(key, 3)

    params = init_params(kp, state_dim, layer_size, action_size, N)
    prepped = prepare_params(params, action_size, N)

    # batch=2 (single-tile path) and batch=200 (TB=128 tiled + padded path)
    for batch, kb in ((2, kx), (200, kx2)):
        x = jax.random.normal(kb, (batch, state_dim), jnp.float32)
        out = cqr_dqn_forward(x, prepped, N, action_size)
        out = jax.block_until_ready(out)

        ref = reference_forward(x, params, N, action_size)
        assert out.shape == (batch, N, action_size)
        assert jnp.allclose(out, ref, atol=1e-3, rtol=1e-3), \
            f"max abs err = {float(jnp.max(jnp.abs(out - ref)))}"

    # TODO(synk): get_action (mean over quantile dim) is a trivial jnp.mean(out, axis=1)
    # on the wrapper output; not worth a separate kernel.
    print("KERNEL_OK")
</pallas_src>

<mosaic_0001>
module attributes {stable_mosaic.version = 11 : i64} {
  func.func @cqr_dqn_kernel(%arg0: i32, %arg1: memref<2x4xf32, #tpu.memory_space<vmem>>, %arg2: memref<4x32xbf16, #tpu.memory_space<vmem>>, %arg3: memref<32x32xbf16, #tpu.memory_space<vmem>>, %arg4: memref<32x128xbf16, #tpu.memory_space<vmem>>, %arg5: memref<3x128xf32, #tpu.memory_space<vmem>>, %arg6: memref<2x128xf32, #tpu.memory_space<vmem>>) attributes {dimension_semantics = [#tpu.dimension_semantics<parallel>], iteration_bounds = array<i64: 1>, scalar_prefetch = 0 : i64, scratch_operands = 0 : i64, tpu.core_type = #tpu.core_type<tc>, window_params = [{transform_indices = @transform_0, window_bounds = array<i64: 2, 4>}, {pipeline_mode = #tpu.pipeline_mode<synchronous>, transform_indices = @transform_1, window_bounds = array<i64: 4, 32>}, {pipeline_mode = #tpu.pipeline_mode<synchronous>, transform_indices = @transform_2, window_bounds = array<i64: 32, 32>}, {pipeline_mode = #tpu.pipeline_mode<synchronous>, transform_indices = @transform_3, window_bounds = array<i64: 32, 128>}, {pipeline_mode = #tpu.pipeline_mode<synchronous>, transform_indices = @transform_4, window_bounds = array<i64: 3, 128>}, {transform_indices = @transform_5, window_bounds = array<i64: 2, 128>}]} {
    %c0 = arith.constant 0 : index
    %c0_0 = arith.constant 0 : index
    %0 = vector.load %arg1[%c0, %c0_0] : memref<2x4xf32, #tpu.memory_space<vmem>>, vector<2x4xf32>
    %1 = arith.truncf %0 : vector<2x4xf32> to vector<2x4xbf16>
    %c0_1 = arith.constant 0 : index
    %c0_2 = arith.constant 0 : index
    %2 = vector.load %arg5[%c0_1, %c0_2] : memref<3x128xf32, #tpu.memory_space<vmem>>, vector<3x128xf32>
    %c0_3 = arith.constant 0 : index
    %c0_4 = arith.constant 0 : index
    %3 = vector.load %arg2[%c0_3, %c0_4] : memref<4x32xbf16, #tpu.memory_space<vmem>>, vector<4x32xbf16>
    %cst = arith.constant dense<0.000000e+00> : vector<2x32xf32>
    %4 = tpu.matmul %1, %3, %cst {dimension_numbers = #tpu.dot_dimension_numbers<[1], [0], [0], [1], [0, 0, 1, 1], [], []>} : vector<2x4xbf16>, vector<4x32xbf16>, vector<2x32xf32> -> vector<2x32xf32>
    %5 = vector.extract_strided_slice %2 {offsets = [0, 0], sizes = [1, 32], strides = [1, 1]} : vector<3x128xf32> to vector<1x32xf32>
    %6 = vector.broadcast %5 : vector<1x32xf32> to vector<2x32xf32>
    %7 = arith.addf %4, %6 : vector<2x32xf32>
    %cst_5 = arith.constant 0.000000e+00 : f32
    %8 = vector.broadcast %cst_5 : f32 to vector<2x32xf32>
    %9 = arith.maximumf %7, %8 : vector<2x32xf32>
    %10 = arith.truncf %9 : vector<2x32xf32> to vector<2x32xbf16>
    %c0_6 = arith.constant 0 : index
    %c0_7 = arith.constant 0 : index
    %11 = vector.load %arg3[%c0_6, %c0_7] : memref<32x32xbf16, #tpu.memory_space<vmem>>, vector<32x32xbf16>
    %cst_8 = arith.constant dense<0.000000e+00> : vector<2x32xf32>
    %12 = tpu.matmul %10, %11, %cst_8 {dimension_numbers = #tpu.dot_dimension_numbers<[1], [0], [0], [1], [0, 0, 1, 1], [], []>} : vector<2x32xbf16>, vector<32x32xbf16>, vector<2x32xf32> -> vector<2x32xf32>
    %13 = vector.extract_strided_slice %2 {offsets = [1, 0], sizes = [1, 32], strides = [1, 1]} : vector<3x128xf32> to vector<1x32xf32>
    %14 = vector.broadcast %13 : vector<1x32xf32> to vector<2x32xf32>
    %15 = arith.addf %12, %14 : vector<2x32xf32>
    %cst_9 = arith.constant 0.000000e+00 : f32
    %16 = vector.broadcast %cst_9 : f32 to vector<2x32xf32>
    %17 = arith.maximumf %15, %16 : vector<2x32xf32>
    %18 = arith.truncf %17 : vector<2x32xf32> to vector<2x32xbf16>
    %c0_10 = arith.constant 0 : index
    %c0_11 = arith.constant 0 : index
    %19 = vector.load %arg4[%c0_10, %c0_11] : memref<32x128xbf16, #tpu.memory_space<vmem>>, vector<32x128xbf16>
    %cst_12 = arith.constant dense<0.000000e+00> : vector<2x128xf32>
    %20 = tpu.matmul %18, %19, %cst_12 {dimension_numbers = #tpu.dot_dimension_numbers<[1], [0], [0], [1], [0, 0, 1, 1], [], []>} : vector<2x32xbf16>, vector<32x128xbf16>, vector<2x128xf32> -> vector<2x128xf32>
    %21 = vector.extract_strided_slice %2 {offsets = [2, 0], sizes = [1, 128], strides = [1, 1]} : vector<3x128xf32> to vector<1x128xf32>
    %22 = vector.broadcast %21 : vector<1x128xf32> to vector<2x128xf32>
    %23 = arith.addf %20, %22 : vector<2x128xf32>
    %c0_13 = arith.constant 0 : index
    %c0_14 = arith.constant 0 : index
    %24 = vector.load %arg6[%c0_13, %c0_14] : memref<2x128xf32, #tpu.memory_space<vmem>>, vector<2x128xf32>
    tpu.vector_store %arg6[%c0_13, %c0_14], %23 {strides = array<i32>} : memref<2x128xf32, #tpu.memory_space<vmem>>, vector<2x128xf32>,
    return
  }
  func.func @transform_0(%arg0: i32) -> (i32, i32) {
    %c0_i32 = arith.constant 0 : i32
    %c0_i32_0 = arith.constant 0 : i32
    return %arg0, %c0_i32 : i32, i32
  }
  func.func @transform_1(%arg0: i32) -> (i32, i32) {
    %c0_i32 = arith.constant 0 : i32
    %c0_i32_0 = arith.constant 0 : i32
    %c0_i32_1 = arith.constant 0 : i32
    return %c0_i32, %c0_i32_0 : i32, i32
  }
  func.func @transform_2(%arg0: i32) -> (i32, i32) {
    %c0_i32 = arith.constant 0 : i32
    %c0_i32_0 = arith.constant 0 : i32
    %c0_i32_1 = arith.constant 0 : i32
    return %c0_i32, %c0_i32_0 : i32, i32
  }
  func.func @transform_3(%arg0: i32) -> (i32, i32) {
    %c0_i32 = arith.constant 0 : i32
    %c0_i32_0 = arith.constant 0 : i32
    %c0_i32_1 = arith.constant 0 : i32
    return %c0_i32, %c0_i32_0 : i32, i32
  }
  func.func @transform_4(%arg0: i32) -> (i32, i32) {
    %c0_i32 = arith.constant 0 : i32
    %c0_i32_0 = arith.constant 0 : i32
    %c0_i32_1 = arith.constant 0 : i32
    return %c0_i32, %c0_i32_0 : i32, i32
  }
  func.func @transform_5(%arg0: i32) -> (i32, i32) {
    %c0_i32 = arith.constant 0 : i32
    %c0_i32_0 = arith.constant 0 : i32
    return %arg0, %c0_i32 : i32, i32
  }
}

</mosaic_0001>

<bundles_post_ra>
// kernel: cqr_dqn_forward.1
= control target key start
LH: loop header
LB: loop body
LE: loop exit
PB: predicated region body
PF: predicated region fallthrough
CT: control target
= control target key end

     0   :  { %10 = vsyncpa [#allocation3], 0  ;;  %s460_s0 = inlined_call_operand.hbm [shape: f32[2,4], index: 0, kind: input, shape index: {}]   ;;  %s461_s1 = inlined_call_operand.vmem [shape: bf16[4,32], index: 1, kind: input, shape index: {}]   ;;  %s462_s2 = inlined_call_operand.hbm [shape: bf16[32,32], index: 2, kind: input, shape index: {}]   ;;  %s463_s3 = inlined_call_operand.hbm [shape: bf16[32,128], index: 3, kind: input, shape index: {}]   ;;  %s464_s4 = inlined_call_operand.vmem [shape: f32[3,128], index: 4, kind: input, shape index: {}]   ;;  %s465_s5 = inlined_call_operand.vmem [shape: f32[2,128], index: 5, kind: output, shape index: {}]  }
   0x1   :  { %11 = vsyncpa [#allocation5], 0  ;;  %s372_s18 = smov [#allocation4]   ;;  %s302_s22 = scalar_lea.hbm %s462_s2, 256 }
   0x2   :  { %s29_s19 = sshll.u32 %s372_s18, 4  ;;  %p303_p0 = scmp.ne.s32.totalorder %s462_s2, %s302_s22  ;;  %s30_s19 = int_to_ptr.vmem [resolvable:$true] %s29_s19 }
   0x3   :  { %p306_p1 = scmp.lt.u32.totalorder %s302_s22, %s462_s2 }
   0x5   :  { %p308_p2 = pnand %p306_p1, %p303_p0 }
   0x7   :  { %311 = shalt.err (!%p308_p2)
}
   0x8   :  { %s312_s27 = scalar_lea.vmem %s30_s19, 256  ;;  %p317_p4 = scmp.lt.s32.totalorder %s30_s19, %s30_s19 }
   0x9   :  { %p313_p3 = scmp.ne.s32.totalorder %s30_s19, %s312_s27  ;;  %p318_p5 = scmp.lt.s32.totalorder %s312_s27, %s312_s27 }
   0xb   :  { %p319_p6 = por %p318_p5, %p317_p4 }
   0xd   :  { %p320_p7 = pnand %p319_p6, %p313_p3 }
   0xf   :  { %323 = shalt.err (!%p320_p7)
}
  0x10   :  { %s373_s28 = smov 64   ;;  %s374_s29 = smov 4  }
  0x11   :  { %35 = dma.hbm_to_vmem [thread:$0]  %s462_s2, 256, %s30_s19, [#allocation5], %s373_s28, %s373_s28, %s374_s29  }
  0x12   :  { %s375_s7 = smov [#allocation2]   ;;  %s376_s9 = smov [#allocation6]  }
  0x13   :  { %s18_s8 = sshll.u32 %s375_s7, 4  ;;  %s41_s10 = sshll.u32 %s376_s9, 4  ;;  %s19_s8 = int_to_ptr.vmem [resolvable:$true] %s18_s8  ;;  %s42_s10 = int_to_ptr.vmem [resolvable:$true] %s41_s10 }
  0x14   :  { %s324_s13 = scalar_lea.hbm %s460_s0, 32 }
  0x15   :  { %p325_p8 = scmp.ne.s32.totalorder %s460_s0, %s324_s13  ;;  %p328_p9 = scmp.lt.u32.totalorder %s324_s13, %s460_s0 }
  0x17   :  { %p330_p10 = pnand %p328_p9, %p325_p8 }
  0x19   :  { %333 = shalt.err (!%p330_p10)
}
  0x1a   :  { %s334_s2 = scalar_lea.vmem %s19_s8, 32  ;;  %p339_p12 = scmp.lt.s32.totalorder %s19_s8, %s19_s8 }
  0x1b   :  { %p335_p11 = scmp.ne.s32.totalorder %s19_s8, %s334_s2  ;;  %p340_p13 = scmp.lt.s32.totalorder %s334_s2, %s334_s2 }
  0x1d   :  { %p341_p0 = por %p340_p13, %p339_p12 }
  0x1f   :  { %p342_p1 = pnand %p341_p0, %p335_p11 }
  0x21   :  { %345 = shalt.err (!%p342_p1)
}
  0x22   :  { %21 = dma.hbm_to_vmem [thread:$0]  %s460_s0, 32, %s19_s8, [#allocation3]  }
  0x23   :  { %s346_s22 = scalar_lea.hbm %s463_s3, 256 }
  0x24   :  { %p347_p2 = scmp.ne.s32.totalorder %s463_s3, %s346_s22  ;;  %p350_p3 = scmp.lt.u32.totalorder %s346_s22, %s463_s3 }
  0x26   :  { %p352_p4 = pnand %p350_p3, %p347_p2 }
  0x28   :  { %355 = shalt.err (!%p352_p4)
}
  0x29   :  { %s356_s27 = scalar_lea.vmem %s42_s10, 256  ;;  %p361_p6 = scmp.lt.s32.totalorder %s42_s10, %s42_s10 }
  0x2a   :  { %p357_p5 = scmp.ne.s32.totalorder %s42_s10, %s356_s27  ;;  %p362_p7 = scmp.lt.s32.totalorder %s356_s27, %s356_s27 }
  0x2c   :  { %p363_p8 = por %p362_p7, %p361_p6 }
  0x2e   :  { %p364_p9 = pnand %p363_p8, %p357_p5 }
  0x30   :  { %367 = shalt.err (!%p364_p9)
}
  0x31   :  { %47 = dma.hbm_to_vmem [thread:$0]  %s463_s3, 256, %s42_s10, [#allocation5], %s373_s28, %s373_s28, %s374_s29  }
  0x32   :  { %368 = dma.done.wait [#allocation3], 32  }
  0x33   :  { %369 = vsyncadd [#allocation3], 4294967264 }
  0x34   :  { %370 = dma.done.wait [#allocation5], 512  }
  0x35   :  { %371 = vsyncadd [#allocation5], 4294966784  ;;  %v377_v0 = vmov 0.0   ;;  %vm378_vm0 = vmmov 0   ;;  %vm72_vm1 = vcmask 1041408   ;;  %vm68_vm2 = vcmask 31744  }
  0x36   :  { %269 = vmatprep.subr.bf16.mxu0 %v377_v0  ;;  %271 = vmatprep.mubr.msk.bf16.mxu0 %vm378_vm0, %v377_v0  ;;  %v63_v1 = vld [vmem:[%s461_s1] sm:$0x3]  ;;  %v60_v2 = vld [vmem:[#allocation2] sm:$0x3]  ;;  %v298_v5 = vld [vmem:[#allocation4] sm:$0xff]   ;;  %v64_v8 = vlaneseq  ;;  %vm138_vm3 = vcmask 261120  }
  0x37   :  { %275 = vmatprep.subr.bf16.mxu1 %v377_v0  ;;  %279 = vmatprep.mubr.msk.bf16.mxu1 %vm378_vm0, %v377_v0  ;;  %v74_v3 = vsel %vm72_vm1, %v63_v1, 0  ;;  %v61_v4 = vpack.c.bf16 %v60_v2, %v60_v2  ;;  %v299_v6 = vld [vmem:[#allocation4 + $0x8] sm:$0xff]   ;;  %v300_v7 = vld [vmem:[#allocation6] sm:$0xff]   ;;  %v301_v20 = vld [vmem:[#allocation6 + $0x8] sm:$0xff]  }
  0x38   :  { %270 = vmatpush3.bf16.msra.mxu0 %v74_v3  ;;  %276 = vmatpush3.bf16.msra.mxu1 %v298_v5  ;;  %v65_v9 = vshrl.u32 %v64_v8, 7  ;;  %v62_v11 = vld [vmem:[%s464_s4] sm:$0x7] }
  0x39   :  { %283 = vmatprep.subr.bf16.mxu0 %v377_v0  ;;  %277 = vmatprep.subr.bf16.mxu1 %v377_v0 }
  0x3a   :  { %v66_v10 = vsub.s32 0, %v65_v9  ;;  %v124_v21 = vsub.s32 1, %v65_v9  ;;  %v190_v30 = vsub.s32 2, %v65_v9 }
  0x3b   :  { %272 = vmatmul.mubr.msk.bf16.vlgmr.msra.gmra.mrb[0].mxu0 %vm68_vm2, %v61_v4 }
  0x3c   :  { %287 = vmatprep.mubr.msk.bf16.mxu0 %vm378_vm0, %v377_v0  ;;  %278 = vmatpush3.bf16.msra.mxu1 %v299_v6  ;;  %v67_v12 = vrot.slane %v62_v11, %v66_v10  ;;  %v125_v22 = vrot.slane %v62_v11, %v124_v21  ;;  %v191_v31 = vrot.slane %v62_v11, %v190_v30 }
  0x3d   :  { %284 = vmatpush3.bf16.msra.mxu0 %v300_v7 }
  0x3e   :  { %285 = vmatprep.subr.bf16.mxu0 %v377_v0 }
  0x41   :  { %286 = vmatpush3.bf16.msra.mxu0 %v301_v20 }
 0x10e   :  { %v110_v13 = vpop.f32.mrb[0].mxu0 }
 0x10f   :  { %v111_v14 = vadd.f32 %v110_v13, %v67_v12  ;;  %v273_v15 = vpop.f32.mrb[1].mxu0 }
 0x110   :  { %v113_v16 = vpop.f32.mrb[2].mxu0 }
 0x111   :  { %v116_v17 = vmax.f32 %v111_v14, 0.0  ;;  %v274_v18 = vpop.f32.mrb[3].mxu0 }
 0x113   :  { %v117_v19 = vpack.c.bf16 %v116_v17, %v116_v17 }
 0x115   :  { %280 = vmatmul.mubr.msk.bf16.vlgmr.msra.gmra.mrb[0].mxu1 %vm138_vm3, %v117_v19 }
 0x1e8   :  { %v176_v23 = vpop.f32.mrb[0].mxu1 }
 0x1e9   :  { %v177_v24 = vadd.f32 %v176_v23, %v125_v22  ;;  %v281_v25 = vpop.f32.mrb[1].mxu1 }
 0x1ea   :  { %v179_v26 = vpop.f32.mrb[2].mxu1 }
 0x1eb   :  { %v182_v27 = vmax.f32 %v177_v24, 0.0  ;;  %v282_v28 = vpop.f32.mrb[3].mxu1 }
 0x1ed   :  { %v183_v29 = vpack.c.bf16 %v182_v27, %v182_v27 }
 0x1ef   :  { %288 = vmatmul.mubr.msk.bf16.vlgmr.msra.gmra.mrb[4].mxu0 %vm138_vm3, %v183_v29 }
 0x2c2   :  { %v241_v32 = vpop.f32.mrb[4].mxu0 }
 0x2c3   :  { %v242_v33 = vadd.f32 %v241_v32, %v191_v31  ;;  %v289_v34 = vpop.f32.mrb[5].mxu0 }
 0x2c4   :  { %v244_v35 = vpop.f32.mrb[6].mxu0 }
 0x2c5   :  { %247 = vst [vmem:[%s465_s5] sm:$0x3] %v242_v33  ;;  %v290_v36 = vpop.f32.mrb[7].mxu0 }
 0x2c6   :  { %252 = vsyncpa [#allocation3], 1 }
 0x2c7   :  { %253 = vsyncpa [#allocation5], 1 }

</bundles_post_ra>
